<compile_context>
chip_gen: v5e
topology: v5e:2x2
jax: 0.10.0
libtpu: 0.0.40
codegen_flags: <defaults>
</compile_context>

<pallas_src>
import numpy as np
import jax
import jax.numpy as jnp
from jax.experimental import pallas as pl
from jax.experimental.pallas import tpu as pltpu


_KRON_MAX_NPIX = 32            # dense (F (x) F) path when npix <= this
_LARGE_NPIX_SINGLE_BUF_F = 512 # single-buffer the constant F inputs above this


# --------------------------------------------------------------------------
# Small-npix path: Kronecker DFT,  Y_flat = X_flat @ (cell^2 * (F (x) F))
# --------------------------------------------------------------------------

def _kron_dft_kernel(x_ref, kr_ref, ki_ref, yr_ref, yi_ref):
    # x_ref: (nchan, npix^2) real; kr/ki: (npix^2, npix^2) real/imag of scaled K.
    x = x_ref[...]
    yr_ref[...] = jnp.dot(x, kr_ref[...], preferred_element_type=jnp.float32)
    yi_ref[...] = jnp.dot(x, ki_ref[...], preferred_element_type=jnp.float32)


def _fourier_cube_kron(packed_cube, cell_size):
    nchan, npix, _ = packed_cube.shape
    n2 = npix * npix

    j = np.arange(npix)
    f = np.exp(-2j * np.pi * np.outer(j, j) / npix)          # symmetric DFT matrix
    k = (float(cell_size) ** 2) * np.kron(f, f)               # (n2, n2), symmetric
    kr = jnp.asarray(k.real, dtype=jnp.float32)
    ki = jnp.asarray(k.imag, dtype=jnp.float32)

    x_flat = packed_cube.reshape(nchan, n2)                    # free (contiguous)

    cp_kwargs = dict(dimension_semantics=("arbitrary",))
    # kr/ki possibly double-buffered + in/out blocks; raise scoped VMEM only if needed.
    est = 4 * (n2 * n2) * 4 + 6 * (nchan * n2) * 4
    if est > 12 * (1 << 20):
        cp_kwargs["vmem_limit_bytes"] = int(min(est * 1.3, 100 * (1 << 20)))

    yr, yi = pl.pallas_call(
        _kron_dft_kernel,
        out_shape=(jax.ShapeDtypeStruct((nchan, n2), jnp.float32),
                   jax.ShapeDtypeStruct((nchan, n2), jnp.float32)),
        grid_spec=pltpu.PrefetchScalarGridSpec(
            num_scalar_prefetch=0,
            grid=(1,),
            in_specs=[
                pl.BlockSpec((nchan, n2), lambda i: (0, 0)),
                pl.BlockSpec((n2, n2), lambda i: (0, 0)),
                pl.BlockSpec((n2, n2), lambda i: (0, 0)),
            ],
            out_specs=[
                pl.BlockSpec((nchan, n2), lambda i: (0, 0)),
                pl.BlockSpec((nchan, n2), lambda i: (0, 0)),
            ],
        ),
        compiler_params=pltpu.CompilerParams(**cp_kwargs),
    )(x_flat, kr, ki)

    return yr.reshape(nchan, npix, npix), yi.reshape(nchan, npix, npix)


# --------------------------------------------------------------------------
# General path: channel-batched two-stage DFT with flattened Karatsuba stage
# --------------------------------------------------------------------------

def _make_dft2_kernel(c_blk, npix, flatten_stage2):
    """Per-grid-step kernel: C_blk channels of Y = (s*F) @ X @ (s*F)."""

    def kernel(x_ref, fr_ref, fi_ref, fs_ref, yr_ref, yi_ref, tr_ref, ti_ref):
        fr = fr_ref[...]          # cell_size * cos(phase)
        fi = fi_ref[...]          # cell_size * sin(phase)
        fs = fs_ref[...]          # fr + fi (host-precomputed, Karatsuba helper)

        # ---- Stage 1 (per channel, real input): T_c = (s*F) @ X_c ----------
        # 2 small matmuls per channel, staged into VMEM scratch.
        for c in range(c_blk):
            xc = x_ref[c]
            tr_ref[c] = jnp.dot(fr, xc, preferred_element_type=jnp.float32)
            ti_ref[c] = jnp.dot(fi, xc, preferred_element_type=jnp.float32)

        # ---- Stage 2 (complex): Y = T @ (s*F), 3-matmul Karatsuba ----------
        if flatten_stage2:
            # Flatten the channel block so the 3 expensive matmuls run with
            # M = c_blk * npix (fills the MXU M-dim).
            tr = tr_ref[...].reshape(c_blk * npix, npix)
            ti = ti_ref[...].reshape(c_blk * npix, npix)
            p1 = jnp.dot(tr, fr, preferred_element_type=jnp.float32)
            p2 = jnp.dot(ti, fi, preferred_element_type=jnp.float32)
            p3 = jnp.dot(tr + ti, fs, preferred_element_type=jnp.float32)
            yr_ref[...] = (p1 - p2).reshape(c_blk, npix, npix)
            yi_ref[...] = (p3 - p1 - p2).reshape(c_blk, npix, npix)
        else:
            # npix not a multiple of 8: keep everything per channel (no
            # layout-crossing reshapes).
            for c in range(c_blk):
                tr = tr_ref[c]
                ti = ti_ref[c]
                p1 = jnp.dot(tr, fr, preferred_element_type=jnp.float32)
                p2 = jnp.dot(ti, fi, preferred_element_type=jnp.float32)
                p3 = jnp.dot(tr + ti, fs, preferred_element_type=jnp.float32)
                yr_ref[c] = p1 - p2
                yi_ref[c] = p3 - p1 - p2

    return kernel


def _pick_channel_block(nchan, npix):
    """Pick C_blk | nchan so C_blk*npix >= 256 (fill MXU M) under a VMEM budget,
    preferring >=2 grid steps (megacore) when that still fills the MXU."""
    per_chan_bytes = 4 * npix * npix
    # rough live bytes per channel in the pipeline: 2 input bufs + 4 output bufs
    # + scratch + f32 intermediates
    budget = 24 * (1 << 20)
    max_by_vmem = max(1, budget // (12 * per_chan_bytes))

    divisors = [d for d in range(1, nchan + 1)
                if nchan % d == 0 and d <= max_by_vmem]
    if not divisors:
        divisors = [1]
    target = -(-256 // npix)  # ceil(256 / npix)

    prefer = [d for d in divisors if d >= target and nchan // d >= 2]
    if prefer:
        return min(prefer)
    prefer = [d for d in divisors if d >= target]
    if prefer:
        return min(prefer)
    return max(divisors)


def _vmem_limit_bytes(c_blk, npix):
    """Raise the scoped VMEM limit only when the chosen blocks need it."""
    per = 4 * npix * npix
    est = per * (12 * c_blk + 8)          # channel blocks + scratch + fr/fi/fs
    if est > 12 * (1 << 20):
        return int(min(est * 1.3, 100 * (1 << 20)))
    return None


def _fourier_cube_general(packed_cube, cell_size):
    nchan, npix, _ = packed_cube.shape

    # sqrt(cell_size**2) = cell_size baked into F; applied in BOTH stages so the
    # net factor is exactly cell_size**2 (no in-kernel scale multiplies).
    j = np.arange(npix)
    phase = -2.0 * np.pi * np.outer(j, j) / npix
    s = float(cell_size)
    fr_np = (s * np.cos(phase)).astype(np.float32)
    fi_np = (s * np.sin(phase)).astype(np.float32)
    fr = jnp.asarray(fr_np)
    fi = jnp.asarray(fi_np)
    fs = jnp.asarray(fr_np + fi_np)       # Karatsuba helper (Fr + Fi)

    c_blk = _pick_channel_block(nchan, npix)
    flatten_stage2 = (npix % 8 == 0)      # merge (C, npix) sublanes only if aligned
    kernel = _make_dft2_kernel(c_blk, npix, flatten_stage2)
    grid = (nchan // c_blk,)

    # Constant-index_map F inputs: single-buffer them for very large npix so the
    # double-buffered copies don't eat v7x's 64 MiB VMEM.
    if npix >= _LARGE_NPIX_SINGLE_BUF_F:
        f_spec = pl.BlockSpec((npix, npix), lambda c: (0, 0),
                              pipeline_mode=pl.Buffered(1))
    else:
        f_spec = pl.BlockSpec((npix, npix), lambda c: (0, 0))
    # TODO(synk): for npix >= ~1024 on v7x, additionally tile the output column
    # dimension (extra grid axis) so f32 blocks fit the 64 MiB VMEM.

    cp_kwargs = dict(dimension_semantics=("parallel",))
    vmem_limit = _vmem_limit_bytes(c_blk, npix)
    if vmem_limit is not None:
        cp_kwargs["vmem_limit_bytes"] = vmem_limit

    yr, yi = pl.pallas_call(
        kernel,
        out_shape=(jax.ShapeDtypeStruct((nchan, npix, npix), jnp.float32),
                   jax.ShapeDtypeStruct((nchan, npix, npix), jnp.float32)),
        grid_spec=pltpu.PrefetchScalarGridSpec(
            num_scalar_prefetch=0,
            grid=grid,
            in_specs=[
                pl.BlockSpec((c_blk, npix, npix), lambda c: (c, 0, 0)),
                f_spec,
                f_spec,
                f_spec,
            ],
            out_specs=[
                pl.BlockSpec((c_blk, npix, npix), lambda c: (c, 0, 0)),
                pl.BlockSpec((c_blk, npix, npix), lambda c: (c, 0, 0)),
            ],
            scratch_shapes=[
                pltpu.VMEM((c_blk, npix, npix), jnp.float32),   # Tr staging
                pltpu.VMEM((c_blk, npix, npix), jnp.float32),   # Ti staging
            ],
        ),
        compiler_params=pltpu.CompilerParams(**cp_kwargs),
    )(packed_cube, fr, fi, fs)

    return yr, yi


# --------------------------------------------------------------------------
# Public API (matches FourierCube.forward semantics)
# --------------------------------------------------------------------------

def fourier_cube_forward_parts(packed_cube, cell_size):
    """Returns (real, imag) f32 cubes of cell_size**2 * fft2(packed_cube).

    Use this when the consumer can work with split real/imag parts -- it avoids
    the extra HBM round-trip that materializing complex64 costs.
    """
    nchan, npix, npix2 = packed_cube.shape
    assert npix == npix2, "packed cube must be square in the spatial dims"
    packed_cube = packed_cube.astype(jnp.float32)
    if npix <= _KRON_MAX_NPIX:
        return _fourier_cube_kron(packed_cube, cell_size)
    return _fourier_cube_general(packed_cube, cell_size)


def fourier_cube_forward(packed_cube, cell_size):
    """JAX/Pallas equivalent of FourierCube.forward: complex64 visibility cube.

    NOTE: jax.lax.complex re-reads both f32 cubes and writes an interleaved
    complex64 cube (~2 extra HBM passes of the output). Call
    fourier_cube_forward_parts() if complex64 is not required downstream.
    """
    yr, yi = fourier_cube_forward_parts(packed_cube, cell_size)
    return jax.lax.complex(yr, yi)

# TODO(synk): the persistent `vis` buffer registration and the ground_vis /
# ground_amp / ground_phase plotting helpers (fftshift reformatting) are
# host-side conveniences of the nn.Module and are not part of this kernel.


# --------------------------------------------------------------------------
# Self-test
# --------------------------------------------------------------------------

def _check(vis, cube, cell_size, tol=1e-3):
    ref = (cell_size ** 2) * jnp.fft.fftn(cube.astype(jnp.complex64), axes=(1, 2))
    err = float(jnp.max(jnp.abs(vis - ref)))
    mag = float(jnp.max(jnp.abs(ref))) + 1e-30
    assert err / mag < tol, f"mismatch vs jnp.fft reference: rel err {err / mag}"


if __name__ == "__main__":
    key = jax.random.PRNGKey(0)
    k1, k2 = jax.random.split(key)
    cell_size = 0.005  # arcsec; coords.cell_size in GridCoords

    # 1) Small-npix (Kronecker) path: (nchan, npix, npix) = (4, 16, 16)
    cube_small = jax.random.normal(k1, (4, 16, 16), dtype=jnp.float32)
    vis_small = jax.block_until_ready(fourier_cube_forward(cube_small, cell_size))
    assert vis_small.shape == cube_small.shape and vis_small.dtype == jnp.complex64
    _check(vis_small, cube_small, cell_size)

    # 2) General (channel-batched, flattened-Karatsuba) path: (4, 64, 64)
    cube_gen = jax.random.normal(k2, (4, 64, 64), dtype=jnp.float32)
    vis_gen = jax.block_until_ready(fourier_cube_forward(cube_gen, cell_size))
    assert vis_gen.shape == cube_gen.shape and vis_gen.dtype == jnp.complex64
    _check(vis_gen, cube_gen, cell_size)

    print("KERNEL_OK")
</pallas_src>

<mosaic_0001>
module attributes {stable_mosaic.version = 11 : i64} {
  func.func @_kron_dft_kernel(%arg0: i32, %arg1: memref<4x256xf32, #tpu.memory_space<vmem>>, %arg2: memref<256x256xf32, #tpu.memory_space<vmem>>, %arg3: memref<256x256xf32, #tpu.memory_space<vmem>>, %arg4: memref<4x256xf32, #tpu.memory_space<vmem>>, %arg5: memref<4x256xf32, #tpu.memory_space<vmem>>) attributes {dimension_semantics = [#tpu.dimension_semantics<arbitrary>], iteration_bounds = array<i64: 1>, scalar_prefetch = 0 : i64, scratch_operands = 0 : i64, tpu.core_type = #tpu.core_type<tc>, window_params = [{pipeline_mode = #tpu.pipeline_mode<synchronous>, transform_indices = @transform_0, window_bounds = array<i64: 4, 256>}, {pipeline_mode = #tpu.pipeline_mode<synchronous>, transform_indices = @transform_1, window_bounds = array<i64: 256, 256>}, {pipeline_mode = #tpu.pipeline_mode<synchronous>, transform_indices = @transform_2, window_bounds = array<i64: 256, 256>}, {pipeline_mode = #tpu.pipeline_mode<synchronous>, transform_indices = @transform_3, window_bounds = array<i64: 4, 256>}, {pipeline_mode = #tpu.pipeline_mode<synchronous>, transform_indices = @transform_4, window_bounds = array<i64: 4, 256>}]} {
    %c0 = arith.constant 0 : index
    %c0_0 = arith.constant 0 : index
    %0 = vector.load %arg1[%c0, %c0_0] : memref<4x256xf32, #tpu.memory_space<vmem>>, vector<4x256xf32>
    %c0_1 = arith.constant 0 : index
    %c0_2 = arith.constant 0 : index
    %1 = vector.load %arg2[%c0_1, %c0_2] : memref<256x256xf32, #tpu.memory_space<vmem>>, vector<256x256xf32>
    %cst = arith.constant dense<0.000000e+00> : vector<4x256xf32>
    %2 = tpu.matmul %0, %1, %cst {dimension_numbers = #tpu.dot_dimension_numbers<[1], [0], [0], [1], [0, 0, 1, 1], [], []>} : vector<4x256xf32>, vector<256x256xf32>, vector<4x256xf32> -> vector<4x256xf32>
    %c0_3 = arith.constant 0 : index
    %c0_4 = arith.constant 0 : index
    %3 = vector.load %arg4[%c0_3, %c0_4] : memref<4x256xf32, #tpu.memory_space<vmem>>, vector<4x256xf32>
    tpu.vector_store %arg4[%c0_3, %c0_4], %2 {strides = array<i32>} : memref<4x256xf32, #tpu.memory_space<vmem>>, vector<4x256xf32>,
    %c0_5 = arith.constant 0 : index
    %c0_6 = arith.constant 0 : index
    %4 = vector.load %arg3[%c0_5, %c0_6] : memref<256x256xf32, #tpu.memory_space<vmem>>, vector<256x256xf32>
    %cst_7 = arith.constant dense<0.000000e+00> : vector<4x256xf32>
    %5 = tpu.matmul %0, %4, %cst_7 {dimension_numbers = #tpu.dot_dimension_numbers<[1], [0], [0], [1], [0, 0, 1, 1], [], []>} : vector<4x256xf32>, vector<256x256xf32>, vector<4x256xf32> -> vector<4x256xf32>
    %c0_8 = arith.constant 0 : index
    %c0_9 = arith.constant 0 : index
    %6 = vector.load %arg5[%c0_8, %c0_9] : memref<4x256xf32, #tpu.memory_space<vmem>>, vector<4x256xf32>
    tpu.vector_store %arg5[%c0_8, %c0_9], %5 {strides = array<i32>} : memref<4x256xf32, #tpu.memory_space<vmem>>, vector<4x256xf32>,
    return
  }
  func.func @transform_0(%arg0: i32) -> (i32, i32) {
    %c0_i32 = arith.constant 0 : i32
    %c0_i32_0 = arith.constant 0 : i32
    %c0_i32_1 = arith.constant 0 : i32
    return %c0_i32, %c0_i32_0 : i32, i32
  }
  func.func @transform_1(%arg0: i32) -> (i32, i32) {
    %c0_i32 = arith.constant 0 : i32
    %c0_i32_0 = arith.constant 0 : i32
    %c0_i32_1 = arith.constant 0 : i32
    return %c0_i32, %c0_i32_0 : i32, i32
  }
  func.func @transform_2(%arg0: i32) -> (i32, i32) {
    %c0_i32 = arith.constant 0 : i32
    %c0_i32_0 = arith.constant 0 : i32
    %c0_i32_1 = arith.constant 0 : i32
    return %c0_i32, %c0_i32_0 : i32, i32
  }
  func.func @transform_3(%arg0: i32) -> (i32, i32) {
    %c0_i32 = arith.constant 0 : i32
    %c0_i32_0 = arith.constant 0 : i32
    %c0_i32_1 = arith.constant 0 : i32
    return %c0_i32, %c0_i32_0 : i32, i32
  }
  func.func @transform_4(%arg0: i32) -> (i32, i32) {
    %c0_i32 = arith.constant 0 : i32
    %c0_i32_0 = arith.constant 0 : i32
    %c0_i32_1 = arith.constant 0 : i32
    return %c0_i32, %c0_i32_0 : i32, i32
  }
}

</mosaic_0001>

<bundles_post_ra>
// kernel: tpu_custom_call.1
= control target key start
LH: loop header
LB: loop body
LE: loop exit
PB: predicated region body
PF: predicated region fallthrough
CT: control target
= control target key end

     0   :  { %10 = vsyncpa [#allocation3], 0  ;;  %s602_s0 = inlined_call_operand.hbm [shape: f32[4,256], index: 0, kind: input, shape index: {}]   ;;  %s603_s1 = inlined_call_operand.hbm [shape: f32[256,256], index: 1, kind: input, shape index: {}]   ;;  %s604_s2 = inlined_call_operand.hbm [shape: f32[256,256], index: 2, kind: input, shape index: {}]   ;;  %s605_s3 = inlined_call_operand.hbm [shape: f32[4,256], index: 3, kind: output, shape index: {0}]   ;;  %s606_s4 = inlined_call_operand.hbm [shape: f32[4,256], index: 4, kind: output, shape index: {1}]  }
   0x1   :  { %11 = vsyncpa [#allocation6], 0 }
   0x2   :  { %12 = vsyncpa [#allocation4], 0  ;;  %s29_s17 = sshll.u32 %s603_s1, 4  ;;  %s30_s17 = int_to_ptr.hbm [resolvable:$true] %s29_s17 }
   0x3   :  { %13 = vsyncpa [#allocation10], 0  ;;  %s545_s18 = smov [#allocation5]   ;;  %s19_s22 = sshll.u32 %s602_s0, 4  ;;  %s20_s22 = int_to_ptr.hbm [resolvable:$true] %s19_s22 }
   0x4   :  { %s31_s19 = sshll.u32 %s545_s18, 4  ;;  %s546_s23 = smov 256   ;;  %s32_s19 = int_to_ptr.vmem [resolvable:$true] %s31_s19 }
   0x5   :  { %s547_s24 = smov 16   ;;  %s548_s25 = smov [#allocation2]  }
   0x6   :  { %37 = dma.hbm_to_vmem [thread:$0]  %s30_s17, 8192, %s32_s19, [#allocation6], %s546_s23, %s546_s23, %s547_s24  }
   0x7   :  { %s21_s26 = sshll.u32 %s548_s25, 4  ;;  %s42_s29 = sshll.u32 %s604_s2, 4  ;;  %s22_s26 = int_to_ptr.vmem [resolvable:$true] %s21_s26  ;;  %s43_s29 = int_to_ptr.hbm [resolvable:$true] %s42_s29 }
   0x8   :  { %24 = dma.hbm_to_vmem [thread:$0]  %s20_s22, 128, %s22_s26, [#allocation3]  }
   0x9   :  { %s549_s1 = smov [#allocation7]  }
   0xa   :  { %s44_s30 = sshll.u32 %s549_s1, 4  ;;  %s45_s30 = int_to_ptr.vmem [resolvable:$true] %s44_s30 }
   0xb   :  { %50 = dma.hbm_to_vmem [thread:$0]  %s43_s29, 8192, %s45_s30, [#allocation6], %s546_s23, %s546_s23, %s547_s24  }
   0xc   :  { %537 = dma.done.wait [#allocation3], 128  }
   0xd   :  { %538 = vsyncadd [#allocation3], 4294967168 }
   0xe   :  { %539 = dma.done.wait [#allocation6], 16384  }
   0xf   :  { %540 = vsyncadd [#allocation6], 4294950912  ;;  %v95_v0 = vld [vmem:[#allocation5 + $0xf8] sm:$0xff]  ;;  %v93_v2 = vld [vmem:[#allocation5 + $0xe8] sm:$0xff]  ;;  %s550_s0 = smov [#allocation8]   ;;  %s383_s7 = sshll.u32 %s605_s3, 4  ;;  %s384_s7 = int_to_ptr.hbm [resolvable:$true] %s383_s7 }
  0x10   :  { %v127_v1 = vld [vmem:[#allocation5 + $0x1f8] sm:$0xff]  ;;  %174 = vmatpush.msra.mxu2 %v95_v0  ;;  %v125_v3 = vld [vmem:[#allocation5 + $0x1e8] sm:$0xff]  ;;  %v94_v6 = vld [vmem:[#allocation5 + $0xf0] sm:$0xff]  ;;  %s381_s2 = sshll.u32 %s550_s0, 4  ;;  %vm217_vm0 = vcmask 1043456   ;;  %s551_s8 = smov [#allocation9]   ;;  %s382_s2 = int_to_ptr.vmem [resolvable:$true] %s381_s2 }
  0x11   :  { %194 = vmatpush.msra.mxu3 %v127_v1  ;;  %v91_v4 = vld [vmem:[#allocation5 + $0xd8] sm:$0xff]  ;;  %v89_v7 = vld [vmem:[#allocation5 + $0xc8] sm:$0xff]  ;;  %v126_v8 = vld [vmem:[#allocation5 + $0x1f0] sm:$0xff]  ;;  %134 = vmatpush.msra.mxu0 %v94_v6  ;;  %s392_s9 = sshll.u32 %s551_s8, 4  ;;  %s394_s12 = sshll.u32 %s606_s4, 4  ;;  %s393_s9 = int_to_ptr.vmem [resolvable:$true] %s392_s9  ;;  %s395_s12 = int_to_ptr.hbm [resolvable:$true] %s394_s12 }
  0x12   :  { %v123_v5 = vld [vmem:[#allocation5 + $0x1d8] sm:$0xff]  ;;  %175 = vmatpush.msra.mxu2 %v93_v2  ;;  %v121_v9 = vld [vmem:[#allocation5 + $0x1c8] sm:$0xff]  ;;  %154 = vmatpush.msra.mxu1 %v126_v8  ;;  %v92_v10 = vld [vmem:[#allocation5 + $0xe0] sm:$0xff] }
  0x13   :  { %195 = vmatpush.msra.mxu3 %v125_v3  ;;  %v124_v11 = vld [vmem:[#allocation5 + $0x1e0] sm:$0xff]  ;;  %v90_v12 = vld [vmem:[#allocation5 + $0xd0] sm:$0xff]  ;;  %v87_v14 = vld [vmem:[#allocation5 + $0xb8] sm:$0xff]  ;;  %135 = vmatpush.msra.mxu0 %v92_v10 }
  0x14   :  { %176 = vmatpush.msra.mxu2 %v91_v4  ;;  %v122_v13 = vld [vmem:[#allocation5 + $0x1d0] sm:$0xff]  ;;  %v119_v15 = vld [vmem:[#allocation5 + $0x1b8] sm:$0xff]  ;;  %155 = vmatpush.msra.mxu1 %v124_v11  ;;  %v88_v16 = vld [vmem:[#allocation5 + $0xc0] sm:$0xff] }
  0x15   :  { %196 = vmatpush.msra.mxu3 %v123_v5  ;;  %v120_v17 = vld [vmem:[#allocation5 + $0x1c0] sm:$0xff]  ;;  %v85_v18 = vld [vmem:[#allocation5 + $0xa8] sm:$0xff]  ;;  %136 = vmatpush.msra.mxu0 %v90_v12  ;;  %v86_v20 = vld [vmem:[#allocation5 + $0xb0] sm:$0xff] }
  0x16   :  { %177 = vmatpush.msra.mxu2 %v89_v7  ;;  %v117_v19 = vld [vmem:[#allocation5 + $0x1a8] sm:$0xff]  ;;  %156 = vmatpush.msra.mxu1 %v122_v13  ;;  %v118_v21 = vld [vmem:[#allocation5 + $0x1b0] sm:$0xff]  ;;  %v83_v22 = vld [vmem:[#allocation5 + $0x98] sm:$0xff] }
  0x17   :  { %197 = vmatpush.msra.mxu3 %v121_v9  ;;  %v115_v23 = vld [vmem:[#allocation5 + $0x198] sm:$0xff]  ;;  %137 = vmatpush.msra.mxu0 %v88_v16  ;;  %v84_v24 = vld [vmem:[#allocation5 + $0xa0] sm:$0xff]  ;;  %v81_v26 = vld [vmem:[#allocation5 + $0x88] sm:$0xff] }
  0x18   :  { %178 = vmatpush.msra.mxu2 %v87_v14  ;;  %157 = vmatpush.msra.mxu1 %v120_v17  ;;  %v116_v25 = vld [vmem:[#allocation5 + $0x1a0] sm:$0xff]  ;;  %v113_v27 = vld [vmem:[#allocation5 + $0x188] sm:$0xff]  ;;  %v82_v28 = vld [vmem:[#allocation5 + $0x90] sm:$0xff] }
  0x19   :  { %198 = vmatpush.msra.mxu3 %v119_v15  ;;  %138 = vmatpush.msra.mxu0 %v86_v20  ;;  %v114_v29 = vld [vmem:[#allocation5 + $0x190] sm:$0xff]  ;;  %v79_v30 = vld [vmem:[#allocation5 + $0x78] sm:$0xff]  ;;  %v80_v32 = vld [vmem:[#allocation5 + $0x80] sm:$0xff] }
  0x1a   :  { %179 = vmatpush.msra.mxu2 %v85_v18  ;;  %158 = vmatpush.msra.mxu1 %v118_v21  ;;  %v111_v31 = vld [vmem:[#allocation5 + $0x178] sm:$0xff]  ;;  %v112_v33 = vld [vmem:[#allocation5 + $0x180] sm:$0xff]  ;;  %v77_v34 = vld [vmem:[#allocation5 + $0x68] sm:$0xff] }
  0x1b   :  { %199 = vmatpush.msra.mxu3 %v117_v19  ;;  %139 = vmatpush.msra.mxu0 %v84_v24  ;;  %v109_v35 = vld [vmem:[#allocation5 + $0x168] sm:$0xff]  ;;  %v78_v36 = vld [vmem:[#allocation5 + $0x70] sm:$0xff]  ;;  %v75_v38 = vld [vmem:[#allocation5 + $0x58] sm:$0xff] }
  0x1c   :  { %180 = vmatpush.msra.mxu2 %v83_v22  ;;  %159 = vmatpush.msra.mxu1 %v116_v25  ;;  %v110_v37 = vld [vmem:[#allocation5 + $0x170] sm:$0xff]  ;;  %v107_v39 = vld [vmem:[#allocation5 + $0x158] sm:$0xff]  ;;  %v76_v40 = vld [vmem:[#allocation5 + $0x60] sm:$0xff] }
  0x1d   :  { %200 = vmatpush.msra.mxu3 %v115_v23  ;;  %140 = vmatpush.msra.mxu0 %v82_v28  ;;  %v108_v41 = vld [vmem:[#allocation5 + $0x160] sm:$0xff]  ;;  %v73_v42 = vld [vmem:[#allocation5 + $0x48] sm:$0xff]  ;;  %v74_v44 = vld [vmem:[#allocation5 + $0x50] sm:$0xff] }
  0x1e   :  { %181 = vmatpush.msra.mxu2 %v81_v26  ;;  %160 = vmatpush.msra.mxu1 %v114_v29  ;;  %v105_v43 = vld [vmem:[#allocation5 + $0x148] sm:$0xff]  ;;  %v106_v45 = vld [vmem:[#allocation5 + $0x150] sm:$0xff]  ;;  %v71_v46 = vld [vmem:[#allocation5 + $0x38] sm:$0xff] }
  0x1f   :  { %201 = vmatpush.msra.mxu3 %v113_v27  ;;  %141 = vmatpush.msra.mxu0 %v80_v32  ;;  %v103_v47 = vld [vmem:[#allocation5 + $0x138] sm:$0xff]  ;;  %v72_v48 = vld [vmem:[#allocation5 + $0x40] sm:$0xff]  ;;  %v69_v50 = vld [vmem:[#allocation5 + $0x28] sm:$0xff] }
  0x20   :  { %182 = vmatpush.msra.mxu2 %v79_v30  ;;  %161 = vmatpush.msra.mxu1 %v112_v33  ;;  %v104_v49 = vld [vmem:[#allocation5 + $0x140] sm:$0xff]  ;;  %v101_v51 = vld [vmem:[#allocation5 + $0x128] sm:$0xff]  ;;  %v70_v52 = vld [vmem:[#allocation5 + $0x30] sm:$0xff] }
  0x21   :  { %202 = vmatpush.msra.mxu3 %v111_v31  ;;  %142 = vmatpush.msra.mxu0 %v78_v36  ;;  %v102_v53 = vld [vmem:[#allocation5 + $0x130] sm:$0xff]  ;;  %v67_v54 = vld [vmem:[#allocation5 + $0x18] sm:$0xff]  ;;  %v68_v56 = vld [vmem:[#allocation5 + $0x20] sm:$0xff] }
  0x22   :  { %183 = vmatpush.msra.mxu2 %v77_v34  ;;  %162 = vmatpush.msra.mxu1 %v110_v37  ;;  %v99_v55 = vld [vmem:[#allocation5 + $0x118] sm:$0xff]  ;;  %v100_v57 = vld [vmem:[#allocation5 + $0x120] sm:$0xff]  ;;  %v65_v58 = vld [vmem:[#allocation5 + $0x8] sm:$0xff] }
  0x23   :  { %203 = vmatpush.msra.mxu3 %v109_v35  ;;  %143 = vmatpush.msra.mxu0 %v76_v40  ;;  %v97_v59 = vld [vmem:[#allocation5 + $0x108] sm:$0xff]  ;;  %v252_v60 = vld [vmem:[#allocation7 + $0xf8] sm:$0xff]  ;;  %v66_v62 = vld [vmem:[#allocation5 + $0x10] sm:$0xff] }
  0x24   :  { %184 = vmatpush.msra.mxu2 %v75_v38  ;;  %163 = vmatpush.msra.mxu1 %v108_v41  ;;  %v284_v61 = vld [vmem:[#allocation7 + $0x1f8] sm:$0xff]  ;;  %v98_v63 = vld [vmem:[#allocation5 + $0x110] sm:$0xff]  ;;  %v250_v0 = vld [vmem:[#allocation7 + $0xe8] sm:$0xff] }
  0x25   :  { %204 = vmatpush.msra.mxu3 %v107_v39  ;;  %144 = vmatpush.msra.mxu0 %v74_v44  ;;  %v282_v1 = vld [vmem:[#allocation7 + $0x1e8] sm:$0xff]  ;;  %v64_v2 = vld [vmem:[#allocation5] sm:$0xff]  ;;  %v248_v4 = vld [vmem:[#allocation7 + $0xd8] sm:$0xff] }
  0x26   :  { %185 = vmatpush.msra.mxu2 %v73_v42  ;;  %164 = vmatpush.msra.mxu1 %v106_v45  ;;  %v96_v3 = vld [vmem:[#allocation5 + $0x100] sm:$0xff]  ;;  %v280_v5 = vld [vmem:[#allocation7 + $0x1d8] sm:$0xff]  ;;  %v251_v6 = vld [vmem:[#allocation7 + $0xf0] sm:$0xff] }
  0x27   :  { %205 = vmatpush.msra.mxu3 %v105_v43  ;;  %145 = vmatpush.msra.mxu0 %v72_v48  ;;  %v283_v7 = vld [vmem:[#allocation7 + $0x1f0] sm:$0xff]  ;;  %v63_v8 = vld [vmem:[#allocation2] sm:$0xff]  ;;  %v246_v9 = vld [vmem:[#allocation7 + $0xc8] sm:$0xff] }
  0x28   :  { %186 = vmatpush.msra.mxu2 %v71_v46  ;;  %165 = vmatpush.msra.mxu1 %v104_v49  ;;  %v278_v10 = vld [vmem:[#allocation7 + $0x1c8] sm:$0xff]  ;;  %129 = vst [vmem:[#allocation1] ss:$2 sm:$0xff] %v63_v8  ;;  %v249_v11 = vld [vmem:[#allocation7 + $0xe0] sm:$0xff]  ;;  %v244_v13 = vld [vmem:[#allocation7 + $0xb8] sm:$0xff] }
  0x29   :  { %206 = vmatpush.msra.mxu3 %v103_v47  ;;  %146 = vmatpush.msra.mxu0 %v70_v52  ;;  %v281_v12 = vld [vmem:[#allocation7 + $0x1e0] sm:$0xff]  ;;  %v276_v14 = vld [vmem:[#allocation7 + $0x1b8] sm:$0xff]  ;;  %v247_v15 = vld [vmem:[#allocation7 + $0xd0] sm:$0xff] }
  0x2a   :  { %187 = vmatpush.msra.mxu2 %v69_v50  ;;  %166 = vmatpush.msra.mxu1 %v102_v53  ;;  %v279_v16 = vld [vmem:[#allocation7 + $0x1d0] sm:$0xff]  ;;  %v242_v17 = vld [vmem:[#allocation7 + $0xa8] sm:$0xff]  ;;  %v240_v19 = vld [vmem:[#allocation7 + $0x98] sm:$0xff] }
  0x2b   :  { %207 = vmatpush.msra.mxu3 %v101_v51  ;;  %147 = vmatpush.msra.mxu0 %v68_v56  ;;  %v274_v18 = vld [vmem:[#allocation7 + $0x1a8] sm:$0xff]  ;;  %v245_v20 = vld [vmem:[#allocation7 + $0xc0] sm:$0xff]  ;;  %v272_v22 = vld [vmem:[#allocation7 + $0x198] sm:$0xff] }
  0x2c   :  { %188 = vmatpush.msra.mxu2 %v67_v54  ;;  %167 = vmatpush.msra.mxu1 %v100_v57  ;;  %v277_v21 = vld [vmem:[#allocation7 + $0x1c0] sm:$0xff]  ;;  %v243_v23 = vld [vmem:[#allocation7 + $0xb0] sm:$0xff]  ;;  %v238_v27 = vld [vmem:[#allocation7 + $0x88] sm:$0xff] }
  0x2d   :  { %208 = vmatpush.msra.mxu3 %v99_v55  ;;  %148 = vmatpush.msra.mxu0 %v66_v62  ;;  %v275_v24 = vld [vmem:[#allocation7 + $0x1b0] sm:$0xff]  ;;  %v270_v28 = vld [vmem:[#allocation7 + $0x188] sm:$0xff]  ;;  %v241_v29 = vld [vmem:[#allocation7 + $0xa0] sm:$0xff] }
  0x2e   :  { %189 = vmatpush.msra.mxu2 %v65_v58  ;;  %168 = vmatpush.msra.mxu1 %v98_v63  ;;  %v273_v30 = vld [vmem:[#allocation7 + $0x1a0] sm:$0xff]  ;;  %v236_v31 = vld [vmem:[#allocation7 + $0x78] sm:$0xff]  ;;  %v239_v33 = vld [vmem:[#allocation7 + $0x90] sm:$0xff] }
  0x2f   :  { %209 = vmatpush.msra.mxu3 %v97_v59  ;;  %149 = vmatpush.msra.mxu0 %v64_v2  ;;  %v586_v25 = vld.sshfl [vmem:[#allocation1] sm:$0xff pattern:$0x75316420]  ;;  %v588_v26 = vld.sshfl [vmem:[#allocation1 + $0x8] sm:$0xff pattern:$0x75316420] }
  0x30   :  { %330 = vmatpush.msrb.mxu2 %v252_v60  ;;  %169 = vmatpush.msra.mxu1 %v96_v3  ;;  %285 = vst [vmem:[#allocation1] ss:$2 sm:$0xff] %v63_v8  ;;  %v268_v32 = vld [vmem:[#allocation7 + $0x178] sm:$0xff]  ;;  %v271_v34 = vld [vmem:[#allocation7 + $0x190] sm:$0xff]  ;;  %v234_v35 = vld [vmem:[#allocation7 + $0x68] sm:$0xff] }
  0x31   :  { %350 = vmatpush.msrb.mxu3 %v284_v61  ;;  %290 = vmatpush.msrb.mxu0 %v251_v6  ;;  %v266_v36 = vld [vmem:[#allocation7 + $0x168] sm:$0xff]  ;;  %v237_v37 = vld [vmem:[#allocation7 + $0x80] sm:$0xff]  ;;  %v232_v39 = vld [vmem:[#allocation7 + $0x58] sm:$0xff] }
  0x32   :  { %331 = vmatpush.msrb.mxu2 %v250_v0  ;;  %310 = vmatpush.msrb.mxu1 %v283_v7  ;;  %v269_v38 = vld [vmem:[#allocation7 + $0x180] sm:$0xff]  ;;  %v264_v40 = vld [vmem:[#allocation7 + $0x158] sm:$0xff]  ;;  %v230_v41 = vld [vmem:[#allocation7 + $0x48] sm:$0xff] }
  0x33   :  { %351 = vmatpush.msrb.mxu3 %v282_v1  ;;  %291 = vmatpush.msrb.mxu0 %v249_v11  ;;  %v262_v42 = vld [vmem:[#allocation7 + $0x148] sm:$0xff]  ;;  %v235_v43 = vld [vmem:[#allocation7 + $0x70] sm:$0xff]  ;;  %v228_v45 = vld [vmem:[#allocation7 + $0x38] sm:$0xff] }
  0x34   :  { %332 = vmatpush.msrb.mxu2 %v248_v4  ;;  %311 = vmatpush.msrb.mxu1 %v281_v12  ;;  %v267_v44 = vld [vmem:[#allocation7 + $0x170] sm:$0xff]  ;;  %v260_v46 = vld [vmem:[#allocation7 + $0x138] sm:$0xff]  ;;  %v233_v47 = vld [vmem:[#allocation7 + $0x60] sm:$0xff] }
  0x35   :  { %352 = vmatpush.msrb.mxu3 %v280_v5  ;;  %292 = vmatpush.msrb.mxu0 %v247_v15  ;;  %v265_v48 = vld [vmem:[#allocation7 + $0x160] sm:$0xff]  ;;  %v226_v49 = vld [vmem:[#allocation7 + $0x28] sm:$0xff]  ;;  %v231_v51 = vld [vmem:[#allocation7 + $0x50] sm:$0xff] }
  0x36   :  { %333 = vmatpush.msrb.mxu2 %v246_v9  ;;  %312 = vmatpush.msrb.mxu1 %v279_v16  ;;  %v258_v50 = vld [vmem:[#allocation7 + $0x128] sm:$0xff]  ;;  %v263_v52 = vld [vmem:[#allocation7 + $0x150] sm:$0xff]  ;;  %v224_v53 = vld [vmem:[#allocation7 + $0x18] sm:$0xff] }
  0x37   :  { %353 = vmatpush.msrb.mxu3 %v278_v10  ;;  %293 = vmatpush.msrb.mxu0 %v245_v20  ;;  %v256_v54 = vld [vmem:[#allocation7 + $0x118] sm:$0xff]  ;;  %v229_v55 = vld [vmem:[#allocation7 + $0x40] sm:$0xff]  ;;  %v222_v57 = vld [vmem:[#allocation7 + $0x8] sm:$0xff] }
  0x38   :  { %334 = vmatpush.msrb.mxu2 %v244_v13  ;;  %313 = vmatpush.msrb.mxu1 %v277_v21  ;;  %v261_v56 = vld [vmem:[#allocation7 + $0x140] sm:$0xff]  ;;  %v254_v58 = vld [vmem:[#allocation7 + $0x108] sm:$0xff]  ;;  %v286_v59 = vld.sshfl [vmem:[#allocation1] sm:$0xff pattern:$0x75316420] }
  0x39   :  { %354 = vmatpush.msrb.mxu3 %v276_v14  ;;  %294 = vmatpush.msrb.mxu0 %v243_v23  ;;  %v287_v60 = vld.sshfl [vmem:[#allocation1 + $0x8] sm:$0xff pattern:$0x75316420]  ;;  %v227_v61 = vld [vmem:[#allocation7 + $0x30] sm:$0xff]  ;;  %v225_v63 = vld [vmem:[#allocation7 + $0x20] sm:$0xff] }
  0x3a   :  { %335 = vmatpush.msrb.mxu2 %v242_v17  ;;  %314 = vmatpush.msrb.mxu1 %v275_v24  ;;  %v259_v62 = vld [vmem:[#allocation7 + $0x130] sm:$0xff]  ;;  %v257_v0 = vld [vmem:[#allocation7 + $0x120] sm:$0xff] }
  0x3b   :  { %355 = vmatpush.msrb.mxu3 %v274_v18  ;;  %295 = vmatpush.msrb.mxu0 %v241_v29  ;;  %v223_v1 = vld [vmem:[#allocation7 + $0x10] sm:$0xff]  ;;  %v221_v3 = vld [vmem:[#allocation7] sm:$0xff] }
  0x3c   :  { %336 = vmatpush.msrb.mxu2 %v240_v19  ;;  %315 = vmatpush.msrb.mxu1 %v273_v30  ;;  %v255_v2 = vld [vmem:[#allocation7 + $0x110] sm:$0xff]  ;;  %v253_v4 = vld [vmem:[#allocation7 + $0x100] sm:$0xff] }
  0x3d   :  { %356 = vmatpush.msrb.mxu3 %v272_v22  ;;  %296 = vmatpush.msrb.mxu0 %v239_v33 }
  0x3e   :  { %337 = vmatpush.msrb.mxu2 %v238_v27  ;;  %316 = vmatpush.msrb.mxu1 %v271_v34 }
  0x3f   :  { %357 = vmatpush.msrb.mxu3 %v270_v28  ;;  %297 = vmatpush.msrb.mxu0 %v237_v37 }
  0x40   :  { %338 = vmatpush.msrb.mxu2 %v236_v31  ;;  %317 = vmatpush.msrb.mxu1 %v269_v38 }
  0x41   :  { %358 = vmatpush.msrb.mxu3 %v268_v32  ;;  %190 = vmatmul.f32.vlgmr.msra.gmra.mxu2 %v586_v25 }
  0x42   :  { %339 = vmatpush.msrb.mxu2 %v234_v35  ;;  %210 = vmatmul.f32.vlgmr.msra.gmra.mxu3 %v588_v26 }
  0x43   :  { %359 = vmatpush.msrb.mxu3 %v266_v36  ;;  %298 = vmatpush.msrb.mxu0 %v235_v43 }
  0x44   :  { %340 = vmatpush.msrb.mxu2 %v232_v39  ;;  %318 = vmatpush.msrb.mxu1 %v267_v44 }
  0x45   :  { %360 = vmatpush.msrb.mxu3 %v264_v40  ;;  %299 = vmatpush.msrb.mxu0 %v233_v47 }
  0x46   :  { %341 = vmatpush.msrb.mxu2 %v230_v41  ;;  %319 = vmatpush.msrb.mxu1 %v265_v48 }
  0x47   :  { %361 = vmatpush.msrb.mxu3 %v262_v42  ;;  %300 = vmatpush.msrb.mxu0 %v231_v51 }
  0x48   :  { %342 = vmatpush.msrb.mxu2 %v228_v45  ;;  %320 = vmatpush.msrb.mxu1 %v263_v52 }
  0x49   :  { %362 = vmatpush.msrb.mxu3 %v260_v46  ;;  %301 = vmatpush.msrb.mxu0 %v229_v55 }
  0x4a   :  { %343 = vmatpush.msrb.mxu2 %v226_v49  ;;  %321 = vmatpush.msrb.mxu1 %v261_v56 }
  0x4b   :  { %363 = vmatpush.msrb.mxu3 %v258_v50  ;;  %150 = vmatmul.f32.vlgmr.msra.gmra.mxu0 %v586_v25 }
  0x4c   :  { %344 = vmatpush.msrb.mxu2 %v224_v53  ;;  %170 = vmatmul.f32.vlgmr.msra.gmra.mxu1 %v588_v26 }
  0x4d   :  { %364 = vmatpush.msrb.mxu3 %v256_v54  ;;  %302 = vmatpush.msrb.mxu0 %v227_v61 }
  0x4e   :  { %345 = vmatpush.msrb.mxu2 %v222_v57  ;;  %322 = vmatpush.msrb.mxu1 %v259_v62 }
  0x4f   :  { %365 = vmatpush.msrb.mxu3 %v254_v58  ;;  %346 = vmatmul.f32.vlgmr.msrb.gmra.mxu2 %v286_v59 }
  0x50   :  { %366 = vmatmul.f32.vlgmr.msrb.gmra.mxu3 %v287_v60  ;;  %303 = vmatpush.msrb.mxu0 %v225_v63 }
  0x51   :  { %323 = vmatpush.msrb.mxu1 %v257_v0 }
  0x52   :  { %304 = vmatpush.msrb.mxu0 %v223_v1 }
  0x53   :  { %324 = vmatpush.msrb.mxu1 %v255_v2 }
  0x54   :  { %305 = vmatpush.msrb.mxu0 %v221_v3 }
  0x55   :  { %325 = vmatpush.msrb.mxu1 %v253_v4  ;;  %306 = vmatmul.f32.vlgmr.msrb.gmra.mxu0 %v286_v59 }
  0x56   :  { %326 = vmatmul.f32.vlgmr.msrb.gmra.mxu1 %v287_v60 }
  0xc4   :  { %v191_v5 = vpop.f32.mrf.mxu2 }
  0xc5   :  { %v211_v6 = vpop.f32.mrf.mxu3 }
  0xc6   :  { %v212_v7 = vadd.f32 %v211_v6, %v191_v5 }
  0xc8   :  { %v216_v8 = vrot.slane %v212_v7, 4  ;;  %v151_v9 = vpop.f32.mrf.mxu0 }
  0xc9   :  { %v171_v10 = vpop.f32.mrf.mxu1 }
  0xca   :  { %v172_v11 = vadd.f32 %v171_v10, %v151_v9 }
  0xcc   :  { %v218_v12 = vsel %vm217_vm0, %v172_v11, %v216_v8 }
  0xcd   :  { %220 = vst [vmem:[#allocation8] sm:$0xff] %v218_v12 }
  0xce   :  { %386 = dma.vmem_to_hbm [thread:$0]  %s382_s2, 128, %s384_s7, [#allocation4]  }
  0xd2   :  { %v347_v13 = vpop.f32.mrf.mxu2  ;;  %v307_v16 = vpop.f32.mrf.mxu0 }
  0xd3   :  { %v367_v14 = vpop.f32.mrf.mxu3  ;;  %v327_v17 = vpop.f32.mrf.mxu1 }
  0xd4   :  { %v368_v15 = vadd.f32 %v367_v14, %v347_v13  ;;  %v328_v19 = vadd.f32 %v327_v17, %v307_v16 }
  0xd6   :  { %v372_v18 = vrot.slane %v368_v15, 4 }
  0xd8   :  { %v373_v20 = vsel %vm217_vm0, %v328_v19, %v372_v18 }
  0xd9   :  { %375 = vst [vmem:[#allocation9] sm:$0xff] %v373_v20 }
  0xda   :  { %397 = dma.vmem_to_hbm [thread:$0]  %s393_s9, 128, %s395_s12, [#allocation10]  }
  0xdb   :  { %541 = dma.done.wait [#allocation4], 128  }
  0xdc   :  { %542 = vsyncadd [#allocation4], 4294967168 }
  0xdd   :  { %543 = dma.done.wait [#allocation10], 128  }
  0xde   :  { %544 = vsyncadd [#allocation10], 4294967168 }
  0xdf   :  { %406 = vsyncpa [#allocation3], 1 }
  0xe0   :  { %407 = vsyncpa [#allocation6], 1 }
  0xe1   :  { %408 = vsyncpa [#allocation4], 1 }
  0xe2   :  { %409 = vsyncpa [#allocation10], 1 }

</bundles_post_ra>
